<compile_context>
chip_gen: v7x
topology: tpu7x:2x2x1
jax: 0.10.0
libtpu: 0.0.40
codegen_flags: <defaults>
</compile_context>

<pallas_src>
import math

import jax
import jax.numpy as jnp
from jax.experimental import pallas as pl
from jax.experimental.pallas import tpu as pltpu


def _affine_sigmoid_kernel(x_ref, w_ref, b_ref, o_ref):
    # x_ref/o_ref: (ROW_TILE, COL_TILE)   w_ref/b_ref: (ROW_TILE, 1)
    # Depthwise 1x1 conv (groups == channels) == per-row affine (VPU slots),
    # then sigmoid via one tanh (EUP slot) -- cheapest transcendental form.
    a = x_ref[...] * w_ref[...] + b_ref[...]
    o_ref[...] = 0.5 * (jnp.tanh(0.5 * a) + 1.0)


def _pick_fold(nc, hw):
    """Pick fold factor s: view each contiguous per-channel H*W span as (s, hw//s)
    so lanes stay 128-dense (cols % 128 == 0) and the sublane axis fills up
    (rows = N*C*s a multiple of 8).  Covers all divisors of hw (incl. s = H, i.e.
    W on lanes).  Returns 1 if no 128-dense split exists."""
    if hw < 128:
        return 1
    best = None
    for s in range(1, min(hw // 128, 8192) + 1):
        if hw % s == 0 and (hw // s) % 128 == 0:
            if best is None:
                best = s
            if (nc * s) % 8 == 0:
                return s
    return best if best is not None else 1


def model_forward(x_nchw, weight, bias, *, max_row_tile=512, max_col_tile=2048,
                  donate_x=False):
    """Conv2d(C, C, kernel_size=1, groups=C) + Sigmoid.

    x_nchw: (N, C, H, W); weight: (C, 1, 1, 1); bias: (C,).
    """
    N, C, H, W = x_nchw.shape
    hw, nc = H * W, N * C
    dtype = x_nchw.dtype
    nbytes = jnp.dtype(dtype).itemsize

    # ---- transpose-free contiguous view ---------------------------------------
    s = _pick_fold(nc, hw)
    rows, cols = nc * s, hw // s
    x2d = x_nchw.reshape(rows, cols)                 # pure view, no data movement
    # TODO(synk): if hw has no 128-divisible factor (e.g. H=W=14), this falls back to
    # masked partial stores; a padded-lane layout would be needed for full lane density.

    # per-row weight/bias pattern: row r -> channel (r // s) % C, period P = C*s
    P = C * s
    w_pat = jnp.broadcast_to(weight.reshape(C, 1, 1).astype(dtype), (C, s, 1)).reshape(P, 1)
    b_pat = jnp.broadcast_to(bias.reshape(C, 1, 1).astype(dtype), (C, s, 1)).reshape(P, 1)

    # ---- block sizing: up to ~4 MiB f32 blocks, sublane/lane aligned -----------
    col_tile = cols if cols <= max_col_tile else max_col_tile       # 2048 % 128 == 0
    if rows <= max_row_tile:
        row_tile = rows                                             # full extent
    else:
        lcm8p = (8 * P) // math.gcd(8, P)
        if lcm8p <= max_row_tile:
            row_tile = (max_row_tile // lcm8p) * lcm8p              # mult of 8 and of P
        else:
            row_tile = (max_row_tile // 8) * 8                      # mult of 8 only

    # Resident weight/bias: one (row_tile, 1) buffer reused by every row block.
    resident_wb = (row_tile % P == 0)                # rows itself is always N*P
    if resident_wb:
        w_op = jnp.tile(w_pat, (row_tile // P, 1))
        b_op = jnp.tile(b_pat, (row_tile // P, 1))
        wb_index_map = lambda i, j: (0, 0)
    else:
        w_op = jnp.tile(w_pat, (rows // P, 1))
        b_op = jnp.tile(b_pat, (rows // P, 1))
        wb_index_map = lambda i, j: (i, 0)

    grid = (pl.cdiv(rows, row_tile), pl.cdiv(cols, col_tile))

    cost = pl.CostEstimate(
        flops=2 * rows * cols,                       # mul + add per element
        transcendentals=rows * cols,                 # one tanh per element
        bytes_accessed=(2 * rows * cols + 2 * w_op.shape[0]) * nbytes,
    )

    out2d = pl.pallas_call(
        _affine_sigmoid_kernel,
        out_shape=jax.ShapeDtypeStruct((rows, cols), dtype),
        grid_spec=pltpu.PrefetchScalarGridSpec(
            num_scalar_prefetch=0,
            grid=grid,
            in_specs=[
                pl.BlockSpec((row_tile, col_tile), lambda i, j: (i, j)),  # x tile
                pl.BlockSpec((row_tile, 1), wb_index_map),                # per-row weight
                pl.BlockSpec((row_tile, 1), wb_index_map),                # per-row bias
            ],
            out_specs=pl.BlockSpec((row_tile, col_tile), lambda i, j: (i, j)),
        ),
        compiler_params=pltpu.CompilerParams(
            dimension_semantics=("parallel", "parallel"),
            vmem_limit_bytes=32 * 1024 * 1024,       # v5e default is 16 MiB; v7x phys 64 MiB
        ),
        cost_estimate=cost,
        input_output_aliases=({0: 0} if donate_x else {}),
    )(x2d, w_op, b_op)

    return out2d.reshape(N, C, H, W)                 # free view back to NCHW


if __name__ == "__main__":
    key = jax.random.PRNGKey(0)
    kx, kw, kb = jax.random.split(key, 3)

    # The module's Conv2d expects 2 input channels.
    C = 2
    weight = jax.random.normal(kw, (C, 1, 1, 1), dtype=jnp.float32) * 0.5
    bias = jax.random.normal(kb, (C,), dtype=jnp.float32) * 0.1

    def ref_fn(x):
        return jax.nn.sigmoid(x * weight.reshape(1, C, 1, 1) + bias.reshape(1, C, 1, 1))

    # Small shapes consistent with the module (second covers the spec's 64x64 spatial).
    for shape in [(2, C, 16, 16), (1, C, 64, 64)]:
        x = jax.random.normal(kx, shape, dtype=jnp.float32)
        out = jax.block_until_ready(model_forward(x, weight, bias))
        ref = ref_fn(x)
        assert out.shape == shape
        assert jnp.allclose(out, ref, atol=2e-6, rtol=2e-6), \
            float(jnp.max(jnp.abs(out - ref)))

    print("KERNEL_OK")
</pallas_src>

<mosaic_0001>
module attributes {stable_mosaic.version = 11 : i64} {
  func.func @_affine_sigmoid_kernel(%arg0: i32, %arg1: i32, %arg2: memref<8x128xf32, #tpu.memory_space<vmem>>, %arg3: memref<8x1xf32, #tpu.memory_space<vmem>>, %arg4: memref<8x1xf32, #tpu.memory_space<vmem>>, %arg5: memref<8x128xf32, #tpu.memory_space<vmem>>) attributes {dimension_semantics = [#tpu.dimension_semantics<parallel>, #tpu.dimension_semantics<parallel>], iteration_bounds = array<i64: 1, 1>, scalar_prefetch = 0 : i64, scratch_operands = 0 : i64, tpu.core_type = #tpu.core_type<tc>, window_params = [{transform_indices = @transform_0, window_bounds = array<i64: 8, 128>}, {pipeline_mode = #tpu.pipeline_mode<synchronous>, transform_indices = @transform_1, window_bounds = array<i64: 8, 1>}, {pipeline_mode = #tpu.pipeline_mode<synchronous>, transform_indices = @transform_2, window_bounds = array<i64: 8, 1>}, {transform_indices = @transform_3, window_bounds = array<i64: 8, 128>}]} {
    %c0 = arith.constant 0 : index
    %c0_0 = arith.constant 0 : index
    %0 = vector.load %arg2[%c0, %c0_0] : memref<8x128xf32, #tpu.memory_space<vmem>>, vector<8x128xf32>
    %c0_1 = arith.constant 0 : index
    %c0_2 = arith.constant 0 : index
    %1 = vector.load %arg3[%c0_1, %c0_2] : memref<8x1xf32, #tpu.memory_space<vmem>>, vector<8x1xf32>
    %2 = vector.broadcast %1 : vector<8x1xf32> to vector<8x128xf32>
    %3 = arith.mulf %0, %2 : vector<8x128xf32>
    %c0_3 = arith.constant 0 : index
    %c0_4 = arith.constant 0 : index
    %4 = vector.load %arg4[%c0_3, %c0_4] : memref<8x1xf32, #tpu.memory_space<vmem>>, vector<8x1xf32>
    %5 = vector.broadcast %4 : vector<8x1xf32> to vector<8x128xf32>
    %6 = arith.addf %3, %5 : vector<8x128xf32>
    %cst = arith.constant 5.000000e-01 : f32
    %7 = vector.broadcast %cst : f32 to vector<8x128xf32>
    %8 = arith.mulf %7, %6 : vector<8x128xf32>
    %9 = math.tanh %8 : vector<8x128xf32>
    %cst_5 = arith.constant 1.000000e+00 : f32
    %10 = vector.broadcast %cst_5 : f32 to vector<8x128xf32>
    %11 = arith.addf %9, %10 : vector<8x128xf32>
    %cst_6 = arith.constant 5.000000e-01 : f32
    %12 = vector.broadcast %cst_6 : f32 to vector<8x128xf32>
    %13 = arith.mulf %12, %11 : vector<8x128xf32>
    %c0_7 = arith.constant 0 : index
    %c0_8 = arith.constant 0 : index
    %14 = vector.load %arg5[%c0_7, %c0_8] : memref<8x128xf32, #tpu.memory_space<vmem>>, vector<8x128xf32>
    tpu.vector_store %arg5[%c0_7, %c0_8], %13 {strides = array<i32>} : memref<8x128xf32, #tpu.memory_space<vmem>>, vector<8x128xf32>,
    return
  }
  func.func @transform_0(%arg0: i32, %arg1: i32) -> (i32, i32) {
    %c0_i32 = arith.constant 0 : i32
    return %arg0, %arg1 : i32, i32
  }
  func.func @transform_1(%arg0: i32, %arg1: i32) -> (i32, i32) {
    %c0_i32 = arith.constant 0 : i32
    %c0_i32_0 = arith.constant 0 : i32
    %c0_i32_1 = arith.constant 0 : i32
    return %c0_i32, %c0_i32_0 : i32, i32
  }
  func.func @transform_2(%arg0: i32, %arg1: i32) -> (i32, i32) {
    %c0_i32 = arith.constant 0 : i32
    %c0_i32_0 = arith.constant 0 : i32
    %c0_i32_1 = arith.constant 0 : i32
    return %c0_i32, %c0_i32_0 : i32, i32
  }
  func.func @transform_3(%arg0: i32, %arg1: i32) -> (i32, i32) {
    %c0_i32 = arith.constant 0 : i32
    return %arg0, %arg1 : i32, i32
  }
}

</mosaic_0001>

<bundles_post_ra>
// kernel: tpu_custom_call.1
= control target key start
LH: loop header
LB: loop body
LE: loop exit
PB: predicated region body
PF: predicated region fallthrough
CT: control target
= control target key end

     0   :  { %s121_s0 = inlined_call_operand.vmem [shape: f32[8,128], index: 0, kind: input, shape index: {}]   ;;  %s122_s1 = inlined_call_operand.vmem [shape: f32[8,1], index: 1, kind: input, shape index: {}]   ;;  %s123_s2 = inlined_call_operand.vmem [shape: f32[8,1], index: 2, kind: input, shape index: {}]   ;;  %s124_s3 = inlined_call_operand.hbm [shape: f32[8,128], index: 3, kind: output, shape index: {}]  }
   0x1   :  { %v16_v0 = vld [vmem:[%s122_s1] sm:$0xff] }
   0x2   :  { %8 = vsyncpa [#allocation3], 0  ;;  %v78_v1 = vmov 0   ;;  %v23_v2 = vld [vmem:[%s123_s2] sm:$0xff]  ;;  %s79_s1 = smov [#allocation2]  }
   0x3   :  { %51 = vset.pattern.permute.xlu0 %v78_v1  ;;  %v15_v4 = vld [vmem:[%s121_s0] sm:$0xff]  ;;  %s41_s18 = sshll.u32 %s79_s1, 4  ;;  %s42_s18 = int_to_ptr.vmem [resolvable:$true] %s41_s18 }
   0x4   :  { %19 = vperm.xlu0 %51, %v16_v0   ;;  %s54_s19 = scalar_lea.vmem %s42_s18, 128  ;;  %p59_p1 = scmp.lt.s32.totalorder %s42_s18, %s42_s18 }
   0x5   :  { %p55_p0 = scmp.ne.s32.totalorder %s42_s18, %s54_s19  ;;  %p60_p2 = scmp.lt.s32.totalorder %s54_s19, %s54_s19 }
   0x7   :  { %p61_p3 = por %p60_p2, %p59_p1 }
   0x8   :  { %26 = vperm.xlu0 %51, %v23_v2  }
   0x9   :  { %p62_p4 = pnand %p61_p3, %p55_p0 }
  0x83   :  { %v20_v3 = vpop.permute.xlu0 %19 }
  0x84   :  { %v22_v5 = vmul.f32 %v20_v3, %v15_v4 }
  0x87   :  { %v27_v6 = vpop.permute.xlu0 %26 }
  0x88   :  { %v29_v7 = vadd.f32 %v27_v6, %v22_v5 }
  0x8a   :  { %v30_v8 = vmul.f32 0.5, %v29_v7 }
  0x8c   :  { %52 = vtanh.f32 %v30_v8 }
  0x96   :  { %v53_v9 = vpop.eup %52 }
  0x97   :  { %v32_v10 = vadd.f32 1.0, %v53_v9 }
  0x99   :  { %v33_v11 = vmul.f32 0.5, %v32_v10 }
  0x9b   :  { %34 = vst [vmem:[#allocation2] sm:$0xff] %v33_v11 }
  0x9c   :  { %65 = shalt.err (!%p62_p4)
}
  0x9d   :  { %s66_s20 = scalar_lea.hbm %s124_s3, 128 }
  0x9e   :  { %p67_p5 = scmp.ne.s32.totalorder %s124_s3, %s66_s20  ;;  %p70_p6 = scmp.lt.u32.totalorder %s66_s20, %s124_s3 }
  0xa0   :  { %p72_p7 = pnand %p70_p6, %p67_p5 }
  0xa2   :  { %75 = shalt.err (!%p72_p7)
}
  0xa3   :  { %44 = dma.vmem_to_hbm [thread:$0]  %s42_s18, 128, %s124_s3, [#allocation3]  }
  0xa4   :  { %76 = dma.done.wait [#allocation3], 128  }
  0xa5   :  { %77 = vsyncadd [#allocation3], 4294967168 }
  0xa6   :  { %48 = vsyncpa [#allocation3], 1 }

</bundles_post_ra>
